<compile_context>
chip_gen: v5e
topology: v5e:2x2
jax: 0.10.0
libtpu: 0.0.40
codegen_flags: <defaults>
</compile_context>

<pallas_src>
import jax
import jax.numpy as jnp
from jax.experimental import pallas as pl
from jax.experimental.pallas import tpu as pltpu


_IN_FEAT = 9
_LANES = 128
_FLAT = _IN_FEAT * _LANES  # 1152


def _fused_affine_kernel(b_ref, w_ref, x_ref, o_ref):
    # x_ref: (tr, 1152) f32 VMEM tile -- tr*128 batch rows, 9 features each,
    #        fully lane-dense.
    # w_ref: (1152, 128) f32 block-diagonal fused weight (resident in VMEM).
    # b_ref: (1, 1)  f32 SMEM fused bias scalar.
    # o_ref: (tr, 128) f32 lane-dense output tile (unmasked vst).
    o_ref[...] = (
        jnp.dot(x_ref[...], w_ref[...], preferred_element_type=jnp.float32)
        + b_ref[0, 0]
    )


def mlp_forward(x, w1, b1, w2, b2, *, max_rows_per_tile=256):
    """Pallas implementation of D.forward.

    x:  [B, 9] float32
    w1: [3, 9], b1: [3]   (nn.Linear(9, 3))
    w2: [1, 3], b2: [1]   (nn.Linear(3, 1))
    returns [B, 1] float32
    """
    B = x.shape[0]
    x = x.astype(jnp.float32)

    # Fold the two bias-linear layers (no nonlinearity between) into one
    # affine op: y = x @ w_fused + b_fused.
    w_fused = (w2.astype(jnp.float32) @ w1.astype(jnp.float32)).reshape(_IN_FEAT)
    b_fused = (w2.astype(jnp.float32) @ b1.astype(jnp.float32)
               + b2.astype(jnp.float32)).reshape(1, 1)

    # Block-diagonal weight so the contraction is a lane-dense MXU matmul:
    #   w_blk[9*j : 9*(j+1), j] = w_fused    (shape (1152, 128))
    w_blk = jnp.kron(jnp.eye(_LANES, dtype=jnp.float32),
                     w_fused.reshape(_IN_FEAT, 1))

    # The flat layout needs B to be a multiple of 128; pad only if necessary
    # (aligned inputs take a zero-copy path).  Padded rows just produce
    # b_fused and are sliced off below.
    bp = pl.cdiv(B, _LANES) * _LANES
    if bp != B:
        x = jnp.pad(x, ((0, bp - B), (0, 0)))
    nrows = bp // _LANES

    # Flat, fully lane-dense layout: each row packs 128 batch rows x 9 feats.
    x_flat = x.reshape(nrows, _FLAT)

    # Tile over flat rows.  tr = 256 flat rows = 32768 batch rows per step
    # (~1.1 MiB/buffer, double-buffered ~2.3 MiB): safe on v5e/v6e/v7x and big
    # enough to amortize per-grid-step overhead.  Partial edge blocks are
    # masked by Pallas (no wrapper-side padding of the row axis needed).
    tr = nrows if nrows <= max_rows_per_tile else max_rows_per_tile
    grid = (pl.cdiv(nrows, tr),)

    out_flat = pl.pallas_call(
        _fused_affine_kernel,
        out_shape=jax.ShapeDtypeStruct((nrows, _LANES), jnp.float32),
        grid=grid,
        in_specs=[
            pl.BlockSpec(memory_space=pltpu.MemorySpace.SMEM),   # fused bias
            pl.BlockSpec((_FLAT, _LANES), lambda i: (0, 0)),     # block-diag W
            pl.BlockSpec((tr, _FLAT), lambda i: (i, 0)),         # x batch tile
        ],
        out_specs=pl.BlockSpec((tr, _LANES), lambda i: (i, 0)),
        compiler_params=pltpu.CompilerParams(
            dimension_semantics=("parallel",),
        ),
    )(b_fused, w_blk, x_flat)

    # (nrows, 128) -> (bp, 1); row j / lane k is batch index j*128 + k.
    return out_flat.reshape(bp, 1)[:B]


if __name__ == "__main__":
    key = jax.random.PRNGKey(0)

    # Deterministic parameters exactly as in D.__init__ (all ones).
    w1 = jnp.ones((3, 9), dtype=jnp.float32)
    b1 = jnp.ones((3,), dtype=jnp.float32)
    w2 = jnp.ones((1, 3), dtype=jnp.float32)
    b2 = jnp.ones((1,), dtype=jnp.float32)

    def ref_fn(xv):
        return (xv @ w1.T + b1) @ w2.T + b2

    # Small shape consistent with the module (Linear(9, 3) -> Linear(3, 1)).
    B = 8
    x = jax.random.normal(key, (B, 9), dtype=jnp.float32)
    out = jax.block_until_ready(mlp_forward(x, w1, b1, w2, b2))
    assert out.shape == (B, 1)
    assert jnp.allclose(out, ref_fn(x), atol=1e-4, rtol=1e-5)

    # 128-aligned path (no padding, single grid step).
    B2 = 640
    x2 = jax.random.normal(jax.random.PRNGKey(1), (B2, 9), dtype=jnp.float32)
    out2 = jax.block_until_ready(mlp_forward(x2, w1, b1, w2, b2))
    assert out2.shape == (B2, 1)
    assert jnp.allclose(out2, ref_fn(x2), atol=1e-4, rtol=1e-5)

    # Unaligned batch (exercises the pad path) with several flat rows.
    B3 = 1037
    x3 = jax.random.normal(jax.random.PRNGKey(2), (B3, 9), dtype=jnp.float32)
    out3 = jax.block_until_ready(mlp_forward(x3, w1, b1, w2, b2))
    assert out3.shape == (B3, 1)
    assert jnp.allclose(out3, ref_fn(x3), atol=1e-4, rtol=1e-5)

    print("KERNEL_OK")
</pallas_src>

<mosaic_0001>
module attributes {stable_mosaic.version = 11 : i64} {
  func.func @_fused_affine_kernel(%arg0: i32, %arg1: memref<1x1xf32, #tpu.memory_space<smem>>, %arg2: memref<1152x128xf32, #tpu.memory_space<vmem>>, %arg3: memref<1x1152xf32, #tpu.memory_space<vmem>>, %arg4: memref<1x128xf32, #tpu.memory_space<vmem>>) attributes {dimension_semantics = [#tpu.dimension_semantics<parallel>], iteration_bounds = array<i64: 1>, scalar_prefetch = 0 : i64, scratch_operands = 0 : i64, tpu.core_type = #tpu.core_type<tc>, window_params = [{transform_indices = @transform_0, window_bounds = array<i64: 1, 1>}, {pipeline_mode = #tpu.pipeline_mode<synchronous>, transform_indices = @transform_1, window_bounds = array<i64: 1152, 128>}, {transform_indices = @transform_2, window_bounds = array<i64: 1, 1152>}, {transform_indices = @transform_3, window_bounds = array<i64: 1, 128>}]} {
    %c0 = arith.constant 0 : index
    %c0_0 = arith.constant 0 : index
    %0 = vector.load %arg3[%c0, %c0_0] : memref<1x1152xf32, #tpu.memory_space<vmem>>, vector<1x1152xf32>
    %c0_1 = arith.constant 0 : index
    %c0_2 = arith.constant 0 : index
    %1 = vector.load %arg2[%c0_1, %c0_2] : memref<1152x128xf32, #tpu.memory_space<vmem>>, vector<1152x128xf32>
    %cst = arith.constant dense<0.000000e+00> : vector<1x128xf32>
    %2 = tpu.matmul %0, %1, %cst {dimension_numbers = #tpu.dot_dimension_numbers<[1], [0], [0], [1], [0, 0, 1, 1], [], []>} : vector<1x1152xf32>, vector<1152x128xf32>, vector<1x128xf32> -> vector<1x128xf32>
    %c0_3 = arith.constant 0 : index
    %c0_4 = arith.constant 0 : index
    %3 = memref.load %arg1[%c0_3, %c0_4] : memref<1x1xf32, #tpu.memory_space<smem>>
    %4 = vector.broadcast %3 : f32 to vector<1x128xf32>
    %5 = arith.addf %2, %4 : vector<1x128xf32>
    %c0_5 = arith.constant 0 : index
    %c0_6 = arith.constant 0 : index
    %6 = vector.load %arg4[%c0_5, %c0_6] : memref<1x128xf32, #tpu.memory_space<vmem>>, vector<1x128xf32>
    tpu.vector_store %arg4[%c0_5, %c0_6], %5 {strides = array<i32>} : memref<1x128xf32, #tpu.memory_space<vmem>>, vector<1x128xf32>,
    return
  }
  func.func @transform_0(%arg0: i32) -> (i32, i32) {
    %c0_i32 = arith.constant 0 : i32
    %c0_i32_0 = arith.constant 0 : i32
    %c0_i32_1 = arith.constant 0 : i32
    return %c0_i32, %c0_i32_0 : i32, i32
  }
  func.func @transform_1(%arg0: i32) -> (i32, i32) {
    %c0_i32 = arith.constant 0 : i32
    %c0_i32_0 = arith.constant 0 : i32
    %c0_i32_1 = arith.constant 0 : i32
    return %c0_i32, %c0_i32_0 : i32, i32
  }
  func.func @transform_2(%arg0: i32) -> (i32, i32) {
    %c0_i32 = arith.constant 0 : i32
    %c0_i32_0 = arith.constant 0 : i32
    return %arg0, %c0_i32 : i32, i32
  }
  func.func @transform_3(%arg0: i32) -> (i32, i32) {
    %c0_i32 = arith.constant 0 : i32
    %c0_i32_0 = arith.constant 0 : i32
    return %arg0, %c0_i32 : i32, i32
  }
}

</mosaic_0001>

<bundles_post_ra>
// kernel: tpu_custom_call.1
= control target key start
LH: loop header
LB: loop body
LE: loop exit
PB: predicated region body
PF: predicated region fallthrough
CT: control target
= control target key end

     0   :  { %9 = vsyncpa [#allocation4], 0  ;;  %s544_s0 = inlined_call_operand.<no memory space> [shape: f32[1,1], index: 0, kind: input, shape index: {}]   ;;  %s545_s1 = inlined_call_operand.hbm [shape: f32[1152,128], index: 1, kind: input, shape index: {}]   ;;  %s546_s2 = inlined_call_operand.hbm [shape: f32[1,1152], index: 2, kind: input, shape index: {}]   ;;  %s547_s3 = inlined_call_operand.hbm [shape: f32[1,128], index: 3, kind: output, shape index: {}]  }
   0x1   :  { %10 = vsyncpa [#allocation7], 0 }
   0x2   :  { %11 = vsyncpa [#allocation5], 0  ;;  %s18_s14 = sshll.u32 %s545_s1, 4  ;;  %s497_s15 = smov [#allocation3]   ;;  %s19_s14 = int_to_ptr.hbm [resolvable:$true] %s18_s14 }
   0x3   :  { %s20_s16 = sshll.u32 %s497_s15, 4  ;;  %s32_s19 = sshll.u32 %s546_s2, 4  ;;  %s21_s16 = int_to_ptr.vmem [resolvable:$true] %s20_s16  ;;  %s33_s19 = int_to_ptr.hbm [resolvable:$true] %s32_s19 }
   0x4   :  { %s498_s20 = smov 128   ;;  %s499_s21 = smov 8  }
   0x5   :  { %26 = dma.hbm_to_vmem [thread:$0]  %s19_s14, 18432, %s21_s16, [#allocation4], %s498_s20, %s498_s20, %s499_s21  }
   0x6   :  { %s500_s22 = smov [#allocation6]  }
   0x7   :  { %s34_s23 = sshll.u32 %s500_s22, 4  ;;  %s35_s23 = int_to_ptr.vmem [resolvable:$true] %s34_s23 }
   0x8   :  { %37 = dma.hbm_to_vmem [thread:$0]  %s33_s19, 144, %s35_s23, [#allocation7]  }
   0x9   :  { %491 = dma.done.wait [#allocation4], 18432  }
   0xa   :  { %492 = vsyncadd [#allocation4], 4294948864 }
   0xb   :  { %493 = dma.done.wait [#allocation7], 144  }
   0xc   :  { %494 = vsyncadd [#allocation7], 4294967152  ;;  %v63_v0 = vld [vmem:[#allocation3 + $0x78] sm:$0xff]  ;;  %v62_v1 = vld [vmem:[#allocation3 + $0x70] sm:$0xff]  ;;  %s501_s24 = smov [#allocation8]  }
   0xd   :  { %214 = vmatpush.msra.mxu0 %v63_v0  ;;  %v95_v2 = vld [vmem:[#allocation3 + $0x178] sm:$0xff]  ;;  %v61_v3 = vld [vmem:[#allocation3 + $0x68] sm:$0xff]  ;;  %v94_v4 = vld [vmem:[#allocation3 + $0x170] sm:$0xff]  ;;  %s400_s25 = sshll.u32 %s501_s24, 4  ;;  %s401_s25 = int_to_ptr.vmem [resolvable:$true] %s400_s25 }
   0xe   :  { %254 = vmatpush.msra.mxu2 %v95_v2  ;;  %v111_v5 = vld [vmem:[#allocation3 + $0x1f8] sm:$0xff]  ;;  %v93_v7 = vld [vmem:[#allocation3 + $0x168] sm:$0xff]  ;;  %v110_v8 = vld [vmem:[#allocation3 + $0x1f0] sm:$0xff] }
   0xf   :  { %215 = vmatpush.msra.mxu0 %v62_v1  ;;  %274 = vmatpush.msra.mxu3 %v111_v5  ;;  %v79_v6 = vld [vmem:[#allocation3 + $0xf8] sm:$0xff]  ;;  %v60_v9 = vld [vmem:[#allocation3 + $0x60] sm:$0xff]  ;;  %v78_v10 = vld [vmem:[#allocation3 + $0xf0] sm:$0xff] }
  0x10   :  { %255 = vmatpush.msra.mxu2 %v94_v4  ;;  %234 = vmatpush.msra.mxu1 %v79_v6  ;;  %v92_v11 = vld [vmem:[#allocation3 + $0x160] sm:$0xff]  ;;  %v109_v12 = vld [vmem:[#allocation3 + $0x1e8] sm:$0xff]  ;;  %v59_v14 = vld [vmem:[#allocation3 + $0x58] sm:$0xff] }
  0x11   :  { %216 = vmatpush.msra.mxu0 %v61_v3  ;;  %275 = vmatpush.msra.mxu3 %v110_v8  ;;  %v77_v13 = vld [vmem:[#allocation3 + $0xe8] sm:$0xff]  ;;  %v108_v15 = vld [vmem:[#allocation3 + $0x1e0] sm:$0xff]  ;;  %v91_v16 = vld [vmem:[#allocation3 + $0x158] sm:$0xff] }
  0x12   :  { %256 = vmatpush.msra.mxu2 %v93_v7  ;;  %235 = vmatpush.msra.mxu1 %v78_v10  ;;  %v76_v17 = vld [vmem:[#allocation3 + $0xe0] sm:$0xff]  ;;  %v58_v18 = vld [vmem:[#allocation3 + $0x50] sm:$0xff]  ;;  %v107_v19 = vld [vmem:[#allocation3 + $0x1d8] sm:$0xff] }
  0x13   :  { %217 = vmatpush.msra.mxu0 %v60_v9  ;;  %276 = vmatpush.msra.mxu3 %v109_v12  ;;  %v90_v20 = vld [vmem:[#allocation3 + $0x150] sm:$0xff]  ;;  %v75_v21 = vld [vmem:[#allocation3 + $0xd8] sm:$0xff]  ;;  %v57_v22 = vld [vmem:[#allocation3 + $0x48] sm:$0xff] }
  0x14   :  { %257 = vmatpush.msra.mxu2 %v92_v11  ;;  %236 = vmatpush.msra.mxu1 %v77_v13  ;;  %v106_v23 = vld [vmem:[#allocation3 + $0x1d0] sm:$0xff]  ;;  %v89_v24 = vld [vmem:[#allocation3 + $0x148] sm:$0xff]  ;;  %v56_v26 = vld [vmem:[#allocation3 + $0x40] sm:$0xff] }
  0x15   :  { %218 = vmatpush.msra.mxu0 %v59_v14  ;;  %277 = vmatpush.msra.mxu3 %v108_v15  ;;  %v74_v25 = vld [vmem:[#allocation3 + $0xd0] sm:$0xff]  ;;  %v105_v27 = vld [vmem:[#allocation3 + $0x1c8] sm:$0xff]  ;;  %v88_v28 = vld [vmem:[#allocation3 + $0x140] sm:$0xff] }
  0x16   :  { %258 = vmatpush.msra.mxu2 %v91_v16  ;;  %237 = vmatpush.msra.mxu1 %v76_v17  ;;  %v73_v29 = vld [vmem:[#allocation3 + $0xc8] sm:$0xff]  ;;  %v55_v30 = vld [vmem:[#allocation3 + $0x38] sm:$0xff]  ;;  %v104_v31 = vld [vmem:[#allocation3 + $0x1c0] sm:$0xff] }
  0x17   :  { %219 = vmatpush.msra.mxu0 %v58_v18  ;;  %278 = vmatpush.msra.mxu3 %v107_v19  ;;  %v87_v32 = vld [vmem:[#allocation3 + $0x138] sm:$0xff]  ;;  %v72_v33 = vld [vmem:[#allocation3 + $0xc0] sm:$0xff]  ;;  %v54_v34 = vld [vmem:[#allocation3 + $0x30] sm:$0xff] }
  0x18   :  { %259 = vmatpush.msra.mxu2 %v90_v20  ;;  %238 = vmatpush.msra.mxu1 %v75_v21  ;;  %v103_v35 = vld [vmem:[#allocation3 + $0x1b8] sm:$0xff]  ;;  %v86_v36 = vld [vmem:[#allocation3 + $0x130] sm:$0xff]  ;;  %v53_v38 = vld [vmem:[#allocation3 + $0x28] sm:$0xff] }
  0x19   :  { %220 = vmatpush.msra.mxu0 %v57_v22  ;;  %279 = vmatpush.msra.mxu3 %v106_v23  ;;  %v71_v37 = vld [vmem:[#allocation3 + $0xb8] sm:$0xff]  ;;  %v102_v39 = vld [vmem:[#allocation3 + $0x1b0] sm:$0xff]  ;;  %v85_v40 = vld [vmem:[#allocation3 + $0x128] sm:$0xff] }
  0x1a   :  { %260 = vmatpush.msra.mxu2 %v89_v24  ;;  %239 = vmatpush.msra.mxu1 %v74_v25  ;;  %v70_v41 = vld [vmem:[#allocation3 + $0xb0] sm:$0xff]  ;;  %v52_v42 = vld [vmem:[#allocation3 + $0x20] sm:$0xff]  ;;  %v101_v43 = vld [vmem:[#allocation3 + $0x1a8] sm:$0xff] }
  0x1b   :  { %221 = vmatpush.msra.mxu0 %v56_v26  ;;  %280 = vmatpush.msra.mxu3 %v105_v27  ;;  %v84_v44 = vld [vmem:[#allocation3 + $0x120] sm:$0xff]  ;;  %v69_v45 = vld [vmem:[#allocation3 + $0xa8] sm:$0xff]  ;;  %v51_v46 = vld [vmem:[#allocation3 + $0x18] sm:$0xff] }
  0x1c   :  { %261 = vmatpush.msra.mxu2 %v88_v28  ;;  %240 = vmatpush.msra.mxu1 %v73_v29  ;;  %v100_v47 = vld [vmem:[#allocation3 + $0x1a0] sm:$0xff]  ;;  %v83_v48 = vld [vmem:[#allocation3 + $0x118] sm:$0xff]  ;;  %v50_v50 = vld [vmem:[#allocation3 + $0x10] sm:$0xff] }
  0x1d   :  { %222 = vmatpush.msra.mxu0 %v55_v30  ;;  %281 = vmatpush.msra.mxu3 %v104_v31  ;;  %v68_v49 = vld [vmem:[#allocation3 + $0xa0] sm:$0xff]  ;;  %v99_v51 = vld [vmem:[#allocation3 + $0x198] sm:$0xff]  ;;  %v82_v52 = vld [vmem:[#allocation3 + $0x110] sm:$0xff] }
  0x1e   :  { %262 = vmatpush.msra.mxu2 %v87_v32  ;;  %241 = vmatpush.msra.mxu1 %v72_v33  ;;  %v67_v53 = vld [vmem:[#allocation3 + $0x98] sm:$0xff]  ;;  %v49_v54 = vld [vmem:[#allocation3 + $0x8] sm:$0xff]  ;;  %v98_v55 = vld [vmem:[#allocation3 + $0x190] sm:$0xff] }
  0x1f   :  { %223 = vmatpush.msra.mxu0 %v54_v34  ;;  %282 = vmatpush.msra.mxu3 %v103_v35  ;;  %v81_v56 = vld [vmem:[#allocation3 + $0x108] sm:$0xff]  ;;  %v66_v57 = vld [vmem:[#allocation3 + $0x90] sm:$0xff]  ;;  %v48_v58 = vld [vmem:[#allocation3] sm:$0xff] }
  0x20   :  { %263 = vmatpush.msra.mxu2 %v86_v36  ;;  %242 = vmatpush.msra.mxu1 %v71_v37  ;;  %v97_v59 = vld [vmem:[#allocation3 + $0x188] sm:$0xff]  ;;  %v127_v60 = vld [vmem:[#allocation3 + $0x278] sm:$0xff]  ;;  %v80_v61 = vld [vmem:[#allocation3 + $0x100] sm:$0xff] }
  0x21   :  { %224 = vmatpush.msra.mxu0 %v53_v38  ;;  %283 = vmatpush.msra.mxu3 %v102_v39  ;;  %v159_v62 = vld [vmem:[#allocation3 + $0x378] sm:$0xff]  ;;  %v65_v63 = vld [vmem:[#allocation3 + $0x88] sm:$0xff]  ;;  %v126_v0 = vld [vmem:[#allocation3 + $0x270] sm:$0xff] }
  0x22   :  { %264 = vmatpush.msra.mxu2 %v85_v40  ;;  %243 = vmatpush.msra.mxu1 %v70_v41  ;;  %v96_v1 = vld [vmem:[#allocation3 + $0x180] sm:$0xff]  ;;  %v158_v2 = vld [vmem:[#allocation3 + $0x370] sm:$0xff]  ;;  %v175_v3 = vld [vmem:[#allocation3 + $0x3f8] sm:$0xff] }
  0x23   :  { %225 = vmatpush.msra.mxu0 %v52_v42  ;;  %284 = vmatpush.msra.mxu3 %v101_v43  ;;  %v125_v4 = vld [vmem:[#allocation3 + $0x268] sm:$0xff]  ;;  %v64_v5 = vld [vmem:[#allocation3 + $0x80] sm:$0xff]  ;;  %v143_v6 = vld [vmem:[#allocation3 + $0x2f8] sm:$0xff] }
  0x24   :  { %265 = vmatpush.msra.mxu2 %v84_v44  ;;  %244 = vmatpush.msra.mxu1 %v69_v45  ;;  %v157_v7 = vld [vmem:[#allocation3 + $0x368] sm:$0xff]  ;;  %v124_v8 = vld [vmem:[#allocation3 + $0x260] sm:$0xff]  ;;  %v174_v9 = vld [vmem:[#allocation3 + $0x3f0] sm:$0xff] }
  0x25   :  { %226 = vmatpush.msra.mxu0 %v51_v46  ;;  %285 = vmatpush.msra.mxu3 %v100_v47  ;;  %v142_v10 = vld [vmem:[#allocation3 + $0x2f0] sm:$0xff]  ;;  %v156_v11 = vld [vmem:[#allocation3 + $0x360] sm:$0xff]  ;;  %v123_v12 = vld [vmem:[#allocation3 + $0x258] sm:$0xff] }
  0x26   :  { %266 = vmatpush.msra.mxu2 %v83_v48  ;;  %245 = vmatpush.msra.mxu1 %v68_v49  ;;  %v173_v13 = vld [vmem:[#allocation3 + $0x3e8] sm:$0xff]  ;;  %v155_v15 = vld [vmem:[#allocation3 + $0x358] sm:$0xff]  ;;  %v122_v16 = vld [vmem:[#allocation3 + $0x250] sm:$0xff] }
  0x27   :  { %227 = vmatpush.msra.mxu0 %v50_v50  ;;  %286 = vmatpush.msra.mxu3 %v99_v51  ;;  %v141_v14 = vld [vmem:[#allocation3 + $0x2e8] sm:$0xff]  ;;  %v172_v17 = vld [vmem:[#allocation3 + $0x3e0] sm:$0xff]  ;;  %v154_v19 = vld [vmem:[#allocation3 + $0x350] sm:$0xff] }
  0x28   :  { %267 = vmatpush.msra.mxu2 %v82_v52  ;;  %246 = vmatpush.msra.mxu1 %v67_v53  ;;  %v140_v18 = vld [vmem:[#allocation3 + $0x2e0] sm:$0xff]  ;;  %v121_v20 = vld [vmem:[#allocation3 + $0x248] sm:$0xff]  ;;  %v171_v21 = vld [vmem:[#allocation3 + $0x3d8] sm:$0xff] }
  0x29   :  { %228 = vmatpush.msra.mxu0 %v49_v54  ;;  %287 = vmatpush.msra.mxu3 %v98_v55  ;;  %v139_v22 = vld [vmem:[#allocation3 + $0x2d8] sm:$0xff]  ;;  %v153_v23 = vld [vmem:[#allocation3 + $0x348] sm:$0xff]  ;;  %v120_v24 = vld [vmem:[#allocation3 + $0x240] sm:$0xff] }
  0x2a   :  { %268 = vmatpush.msra.mxu2 %v81_v56  ;;  %247 = vmatpush.msra.mxu1 %v66_v57  ;;  %v170_v25 = vld [vmem:[#allocation3 + $0x3d0] sm:$0xff]  ;;  %v152_v27 = vld [vmem:[#allocation3 + $0x340] sm:$0xff]  ;;  %v119_v28 = vld [vmem:[#allocation3 + $0x238] sm:$0xff] }
  0x2b   :  { %229 = vmatpush.msra.mxu0 %v48_v58  ;;  %288 = vmatpush.msra.mxu3 %v97_v59  ;;  %v138_v26 = vld [vmem:[#allocation3 + $0x2d0] sm:$0xff]  ;;  %v169_v29 = vld [vmem:[#allocation3 + $0x3c8] sm:$0xff]  ;;  %v151_v31 = vld [vmem:[#allocation3 + $0x338] sm:$0xff] }
  0x2c   :  { %269 = vmatpush.msra.mxu2 %v80_v61  ;;  %248 = vmatpush.msra.mxu1 %v65_v63  ;;  %v137_v30 = vld [vmem:[#allocation3 + $0x2c8] sm:$0xff]  ;;  %v118_v32 = vld [vmem:[#allocation3 + $0x230] sm:$0xff]  ;;  %v168_v33 = vld [vmem:[#allocation3 + $0x3c0] sm:$0xff] }
  0x2d   :  { %294 = vmatpush.msrb.mxu0 %v127_v60  ;;  %289 = vmatpush.msra.mxu3 %v96_v1  ;;  %v136_v34 = vld [vmem:[#allocation3 + $0x2c0] sm:$0xff]  ;;  %v150_v35 = vld [vmem:[#allocation3 + $0x330] sm:$0xff]  ;;  %v117_v36 = vld [vmem:[#allocation3 + $0x228] sm:$0xff] }
  0x2e   :  { %334 = vmatpush.msrb.mxu2 %v159_v62  ;;  %249 = vmatpush.msra.mxu1 %v64_v5  ;;  %v167_v37 = vld [vmem:[#allocation3 + $0x3b8] sm:$0xff]  ;;  %v149_v39 = vld [vmem:[#allocation3 + $0x328] sm:$0xff]  ;;  %v528_v40 = vld [vmem:[#allocation6] sm:$0xff] }
  0x2f   :  { %295 = vmatpush.msrb.mxu0 %v126_v0  ;;  %354 = vmatpush.msrb.mxu3 %v175_v3  ;;  %v135_v38 = vld [vmem:[#allocation3 + $0x2b8] sm:$0xff]  ;;  %v116_v41 = vld [vmem:[#allocation3 + $0x220] sm:$0xff]  ;;  %v166_v42 = vld [vmem:[#allocation3 + $0x3b0] sm:$0xff]  ;;  %v198_v47 = vperm.slane %v528_v40, 2  ;;  %v196_v51 = vperm.slane %v528_v40, 0  ;;  %v199_v53 = vperm.slane %v528_v40, 3 }
  0x30   :  { %335 = vmatpush.msrb.mxu2 %v158_v2  ;;  %314 = vmatpush.msrb.mxu1 %v143_v6  ;;  %v134_v43 = vld [vmem:[#allocation3 + $0x2b0] sm:$0xff]  ;;  %v148_v44 = vld [vmem:[#allocation3 + $0x320] sm:$0xff]  ;;  %v115_v45 = vld [vmem:[#allocation3 + $0x218] sm:$0xff]  ;;  %v197_v59 = vperm.slane %v528_v40, 1  ;;  %v202_v5 = vperm.slane %v528_v40, 6 }
  0x31   :  { %296 = vmatpush.msrb.mxu0 %v125_v4  ;;  %355 = vmatpush.msrb.mxu3 %v174_v9  ;;  %v165_v46 = vld [vmem:[#allocation3 + $0x3a8] sm:$0xff]  ;;  %v114_v49 = vld [vmem:[#allocation3 + $0x210] sm:$0xff]  ;;  %v147_v50 = vld [vmem:[#allocation3 + $0x318] sm:$0xff]  ;;  %v200_v9 = vperm.slane %v528_v40, 4 }
  0x32   :  { %336 = vmatpush.msrb.mxu2 %v157_v7  ;;  %315 = vmatpush.msrb.mxu1 %v142_v10  ;;  %v133_v48 = vld [vmem:[#allocation3 + $0x2a8] sm:$0xff]  ;;  %v164_v52 = vld [vmem:[#allocation3 + $0x3a0] sm:$0xff]  ;;  %v146_v56 = vld [vmem:[#allocation3 + $0x310] sm:$0xff]  ;;  %v203_v10 = vperm.slane %v528_v40, 7 }
  0x33   :  { %297 = vmatpush.msrb.mxu0 %v124_v8  ;;  %356 = vmatpush.msrb.mxu3 %v173_v13  ;;  %v113_v54 = vld [vmem:[#allocation3 + $0x208] sm:$0xff]  ;;  %v132_v55 = vld [vmem:[#allocation3 + $0x2a0] sm:$0xff]  ;;  %v163_v58 = vld [vmem:[#allocation3 + $0x398] sm:$0xff]  ;;  %v201_v13 = vperm.slane %v528_v40, 5 }
  0x34   :  { %337 = vmatpush.msrb.mxu2 %v156_v11  ;;  %316 = vmatpush.msrb.mxu1 %v141_v14  ;;  %v112_v57 = vld [vmem:[#allocation3 + $0x200] sm:$0xff]  ;;  %v191_v60 = vld [vmem:[#allocation3 + $0x478] sm:$0xff]  ;;  %v145_v62 = vld [vmem:[#allocation3 + $0x308] sm:$0xff] }
  0x35   :  { %298 = vmatpush.msrb.mxu0 %v123_v12  ;;  %357 = vmatpush.msrb.mxu3 %v172_v17  ;;  %v131_v61 = vld [vmem:[#allocation3 + $0x298] sm:$0xff]  ;;  %v190_v63 = vld [vmem:[#allocation3 + $0x470] sm:$0xff]  ;;  %v144_v2 = vld [vmem:[#allocation3 + $0x300] sm:$0xff] }
  0x36   :  { %338 = vmatpush.msrb.mxu2 %v155_v15  ;;  %317 = vmatpush.msrb.mxu1 %v140_v18  ;;  %v162_v0 = vld [vmem:[#allocation3 + $0x390] sm:$0xff]  ;;  %v189_v3 = vld [vmem:[#allocation3 + $0x468] sm:$0xff]  ;;  %v188_v7 = vld [vmem:[#allocation3 + $0x460] sm:$0xff] }
  0x37   :  { %299 = vmatpush.msrb.mxu0 %v122_v16  ;;  %358 = vmatpush.msrb.mxu3 %v171_v21  ;;  %v130_v1 = vld [vmem:[#allocation3 + $0x290] sm:$0xff]  ;;  %v161_v4 = vld [vmem:[#allocation3 + $0x388] sm:$0xff]  ;;  %v160_v8 = vld [vmem:[#allocation3 + $0x380] sm:$0xff] }
  0x38   :  { %339 = vmatpush.msrb.mxu2 %v154_v19  ;;  %318 = vmatpush.msrb.mxu1 %v139_v22  ;;  %v129_v6 = vld [vmem:[#allocation3 + $0x288] sm:$0xff]  ;;  %v187_v11 = vld [vmem:[#allocation3 + $0x458] sm:$0xff]  ;;  %v128_v12 = vld [vmem:[#allocation3 + $0x280] sm:$0xff] }
  0x39   :  { %300 = vmatpush.msrb.mxu0 %v121_v20  ;;  %359 = vmatpush.msrb.mxu3 %v170_v25  ;;  %v186_v14 = vld [vmem:[#allocation3 + $0x450] sm:$0xff]  ;;  %v185_v15 = vld [vmem:[#allocation3 + $0x448] sm:$0xff]  ;;  %v184_v16 = vld [vmem:[#allocation3 + $0x440] sm:$0xff] }
  0x3a   :  { %340 = vmatpush.msrb.mxu2 %v153_v23  ;;  %319 = vmatpush.msrb.mxu1 %v138_v26  ;;  %v183_v17 = vld [vmem:[#allocation3 + $0x438] sm:$0xff]  ;;  %v182_v18 = vld [vmem:[#allocation3 + $0x430] sm:$0xff]  ;;  %v181_v19 = vld [vmem:[#allocation3 + $0x428] sm:$0xff]  ;;  %v193_v26 = vstv %s544_s0  ;;  %s402_s0 = sshll.u32 %s547_s3, 4  ;;  %s403_s0 = int_to_ptr.hbm [resolvable:$true] %s402_s0 }
  0x3b   :  { %301 = vmatpush.msrb.mxu0 %v120_v24  ;;  %360 = vmatpush.msrb.mxu3 %v169_v29  ;;  %v180_v20 = vld [vmem:[#allocation3 + $0x420] sm:$0xff]  ;;  %v179_v21 = vld [vmem:[#allocation3 + $0x418] sm:$0xff]  ;;  %v178_v22 = vld [vmem:[#allocation3 + $0x410] sm:$0xff] }
  0x3c   :  { %341 = vmatpush.msrb.mxu2 %v152_v27  ;;  %320 = vmatpush.msrb.mxu1 %v137_v30  ;;  %v177_v23 = vld [vmem:[#allocation3 + $0x408] sm:$0xff]  ;;  %v176_v24 = vld [vmem:[#allocation3 + $0x400] sm:$0xff] }
  0x3d   :  { %302 = vmatpush.msrb.mxu0 %v119_v28  ;;  %361 = vmatpush.msrb.mxu3 %v168_v33  ;;  %v418_v25 = vld [vmem:[#allocation6 + $0x8] ss:$0 sm:$0xff] }
  0x3e   :  { %342 = vmatpush.msrb.mxu2 %v151_v31  ;;  %321 = vmatpush.msrb.mxu1 %v136_v34 }
  0x3f   :  { %303 = vmatpush.msrb.mxu0 %v118_v32  ;;  %362 = vmatpush.msrb.mxu3 %v167_v37 }
  0x40   :  { %343 = vmatpush.msrb.mxu2 %v150_v35  ;;  %322 = vmatpush.msrb.mxu1 %v135_v38 }
  0x41   :  { %304 = vmatpush.msrb.mxu0 %v117_v36  ;;  %363 = vmatpush.msrb.mxu3 %v166_v42 }
  0x42   :  { %344 = vmatpush.msrb.mxu2 %v149_v39  ;;  %323 = vmatpush.msrb.mxu1 %v134_v43 }
  0x43   :  { %305 = vmatpush.msrb.mxu0 %v116_v41  ;;  %364 = vmatpush.msrb.mxu3 %v165_v46 }
  0x44   :  { %345 = vmatpush.msrb.mxu2 %v148_v44  ;;  %324 = vmatpush.msrb.mxu1 %v133_v48 }
  0x45   :  { %306 = vmatpush.msrb.mxu0 %v115_v45  ;;  %270 = vmatmul.f32.vlgmr.msra.gmra.mxu2 %v198_v47 }
  0x46   :  { %346 = vmatpush.msrb.mxu2 %v147_v50  ;;  %365 = vmatpush.msrb.mxu3 %v164_v52 }
  0x47   :  { %307 = vmatpush.msrb.mxu0 %v114_v49  ;;  %290 = vmatmul.f32.vlgmr.msra.gmra.mxu3 %v199_v53 }
  0x48   :  { %230 = vmatmul.f32.vlgmr.msra.gmra.mxu0 %v196_v51  ;;  %325 = vmatpush.msrb.mxu1 %v132_v55 }
  0x49   :  { %308 = vmatpush.msrb.mxu0 %v113_v54  ;;  %347 = vmatpush.msrb.mxu2 %v146_v56 }
  0x4a   :  { %366 = vmatpush.msrb.mxu3 %v163_v58  ;;  %250 = vmatmul.f32.vlgmr.msra.gmra.mxu1 %v197_v59 }
  0x4b   :  { %309 = vmatpush.msrb.mxu0 %v112_v57  ;;  %326 = vmatpush.msrb.mxu1 %v131_v61 }
  0x4c   :  { %348 = vmatpush.msrb.mxu2 %v145_v62  ;;  %367 = vmatpush.msrb.mxu3 %v162_v0 }
  0x4d   :  { %374 = vmatpush.msra.mxu0 %v191_v60  ;;  %327 = vmatpush.msrb.mxu1 %v130_v1 }
  0x4e   :  { %349 = vmatpush.msrb.mxu2 %v144_v2  ;;  %368 = vmatpush.msrb.mxu3 %v161_v4 }
  0x4f   :  { %375 = vmatpush.msra.mxu0 %v190_v63  ;;  %350 = vmatmul.f32.vlgmr.msrb.gmra.mxu2 %v202_v5 }
  0x50   :  { %328 = vmatpush.msrb.mxu1 %v129_v6  ;;  %369 = vmatpush.msrb.mxu3 %v160_v8 }
  0x51   :  { %376 = vmatpush.msra.mxu0 %v189_v3  ;;  %370 = vmatmul.f32.vlgmr.msrb.gmra.mxu3 %v203_v10 }
  0x52   :  { %310 = vmatmul.f32.vlgmr.msrb.gmra.mxu0 %v200_v9  ;;  %329 = vmatpush.msrb.mxu1 %v128_v12 }
  0x53   :  { %377 = vmatpush.msra.mxu0 %v188_v7  ;;  %330 = vmatmul.f32.vlgmr.msrb.gmra.mxu1 %v201_v13 }
  0x55   :  { %378 = vmatpush.msra.mxu0 %v187_v11 }
  0x57   :  { %379 = vmatpush.msra.mxu0 %v186_v14 }
  0x59   :  { %380 = vmatpush.msra.mxu0 %v185_v15 }
  0x5b   :  { %381 = vmatpush.msra.mxu0 %v184_v16 }
  0x5d   :  { %382 = vmatpush.msra.mxu0 %v183_v17 }
  0x5f   :  { %383 = vmatpush.msra.mxu0 %v182_v18 }
  0x61   :  { %384 = vmatpush.msra.mxu0 %v181_v19 }
  0x63   :  { %385 = vmatpush.msra.mxu0 %v180_v20 }
  0x65   :  { %386 = vmatpush.msra.mxu0 %v179_v21 }
  0x67   :  { %387 = vmatpush.msra.mxu0 %v178_v22 }
  0x69   :  { %388 = vmatpush.msra.mxu0 %v177_v23 }
  0x6b   :  { %389 = vmatpush.msra.mxu0 %v176_v24 }
  0x6c   :  { %390 = vmatmul.f32.vlgmr.msra.gmra.mxu0 %v418_v25 }
  0xc5   :  { %v231_v27 = vpop.f32.mrf.mxu0 }
  0xc6   :  { %v232_v28 = vadd.f32 %v231_v27, %v193_v26 }
  0xc7   :  { %v251_v29 = vpop.f32.mrf.mxu1 }
  0xc8   :  { %v252_v30 = vadd.f32 %v251_v29, %v232_v28  ;;  %v271_v31 = vpop.f32.mrf.mxu2 }
  0xca   :  { %v272_v32 = vadd.f32 %v271_v31, %v252_v30  ;;  %v291_v33 = vpop.f32.mrf.mxu3 }
  0xcc   :  { %v292_v34 = vadd.f32 %v291_v33, %v272_v32 }
  0xcf   :  { %v311_v35 = vpop.f32.mrf.mxu0 }
  0xd0   :  { %v312_v36 = vadd.f32 %v311_v35, %v292_v34  ;;  %v331_v37 = vpop.f32.mrf.mxu1 }
  0xd2   :  { %v332_v38 = vadd.f32 %v331_v37, %v312_v36  ;;  %v351_v39 = vpop.f32.mrf.mxu2 }
  0xd4   :  { %v352_v40 = vadd.f32 %v351_v39, %v332_v38  ;;  %v371_v41 = vpop.f32.mrf.mxu3 }
  0xd6   :  { %v372_v42 = vadd.f32 %v371_v41, %v352_v40 }
  0xe9   :  { %v391_v43 = vpop.f32.mrf.mxu0 }
  0xea   :  { %v392_v44 = vadd.f32 %v391_v43, %v372_v42 }
  0xec   :  { %394 = vst [vmem:[#allocation8] sm:$0x1] %v392_v44 }
  0xed   :  { %405 = dma.vmem_to_hbm [thread:$0]  %s401_s25, 16, %s403_s0, [#allocation5]  }
  0xee   :  { %495 = dma.done.wait [#allocation5], 16  }
  0xef   :  { %496 = vsyncadd [#allocation5], 4294967280 }
  0xf0   :  { %410 = vsyncpa [#allocation4], 1 }
  0xf1   :  { %411 = vsyncpa [#allocation7], 1 }
  0xf2   :  { %412 = vsyncpa [#allocation5], 1 }

</bundles_post_ra>
